<compile_context>
chip_gen: v7x
topology: tpu7x:2x2x1
jax: 0.10.0
libtpu: 0.0.40
codegen_flags: <defaults>
</compile_context>

<pallas_src>
import functools

import jax
import jax.numpy as jnp
from jax.experimental import pallas as pl
from jax.experimental.pallas import tpu as pltpu

_VMEM_LIMIT = 64 * 1024 * 1024  # <= physical VMEM on v5e/v6e (128 MiB) and v7x (64 MiB)


# ----------------------------------------------------------------------------
# Tile choosers (divisor tiles so the grid is exact; fall back to full dim).
# ----------------------------------------------------------------------------
def _pick_tile(dim, target, unit):
    """Largest multiple of `unit` that divides `dim` and is <= target, else `dim`."""
    if dim <= target:
        return dim
    t = (target // unit) * unit
    while t >= unit:
        if dim % t == 0:
            return t
        t -= unit
    return dim


def _choose_head_group(bh, target=8):
    """Heads per attention grid step: a divisor of bh, <= target, preferring >= 2
    grid steps along the head axis (v7x has 2 TensorCores per chip)."""
    divisors = [d for d in range(1, bh + 1) if bh % d == 0 and d <= target]
    with_two_steps = [d for d in divisors if bh // d >= 2]
    if with_two_steps:
        return max(with_two_steps)
    return max(divisors)


# ----------------------------------------------------------------------------
# Kernel 1: tiled linear  y = x @ W^T + b   (W stored torch-style [out, in])
#   grid = (M/tm, N/tn, K/tk); f32 accumulator in VMEM; init/finalize via pl.when.
#   Operands cast to `compute_dtype` (bf16 by default) for the MXU; f32 accumulate.
# ----------------------------------------------------------------------------
def _linear_kernel(x_ref, w_ref, b_ref, o_ref, acc_ref, *, compute_dtype):
    kk = pl.program_id(2)

    @pl.when(kk == 0)
    def _init():
        acc_ref[...] = jnp.zeros_like(acc_ref)

    acc_ref[...] += jax.lax.dot_general(
        x_ref[...].astype(compute_dtype), w_ref[...].astype(compute_dtype),
        dimension_numbers=(((1,), (1,)), ((), ())),
        preferred_element_type=jnp.float32,
    )

    @pl.when(kk == pl.num_programs(2) - 1)
    def _finalize():
        o_ref[...] = (acc_ref[...] + b_ref[...]).astype(o_ref.dtype)


def linear_pallas(x, w, b, compute_dtype=jnp.bfloat16):
    m, k_in = x.shape
    n = w.shape[0]
    tm = _pick_tile(m, 512, 8)       # row tile
    tn = _pick_tile(n, 512, 128)     # output-feature tile (lane-dense when N >= 128)
    tk = _pick_tile(k_in, 512, 128)  # contraction tile

    kern = functools.partial(_linear_kernel, compute_dtype=compute_dtype)
    return pl.pallas_call(
        kern,
        out_shape=jax.ShapeDtypeStruct((m, n), x.dtype),
        grid_spec=pltpu.PrefetchScalarGridSpec(
            num_scalar_prefetch=0,
            grid=(m // tm, n // tn, k_in // tk),
            in_specs=[
                pl.BlockSpec((tm, tk), lambda i, j, kk: (i, kk)),
                pl.BlockSpec((tn, tk), lambda i, j, kk: (j, kk)),
                pl.BlockSpec((1, tn), lambda i, j, kk: (0, j)),
            ],
            out_specs=pl.BlockSpec((tm, tn), lambda i, j, kk: (i, j)),
            scratch_shapes=[pltpu.VMEM((tm, tn), jnp.float32)],
        ),
        compiler_params=pltpu.CompilerParams(
            dimension_semantics=("parallel", "parallel", "arbitrary"),
            vmem_limit_bytes=_VMEM_LIMIT),
    )(x, w, b.reshape(1, n))


# ----------------------------------------------------------------------------
# Kernel 2: flash-style attention in head-leading (B*H, L, D) layout.
#   grid = (BH/G, T/TQ, S/TK); KV axis last ("arbitrary") with running max/sum/acc
#   scratch; one head-batched dot_general per tile (no per-head unroll/slicing).
#   Softmax scale is pre-folded into the Q projection weights; exact division in
#   the epilogue.
# ----------------------------------------------------------------------------
def _flash_attn_kernel(q_ref, k_ref, v_ref, o_ref, m_ref, l_ref, acc_ref, *,
                       compute_dtype):
    ki = pl.program_id(2)

    @pl.when(ki == 0)
    def _init():
        m_ref[...] = jnp.full(m_ref.shape, -jnp.inf, jnp.float32)
        l_ref[...] = jnp.zeros_like(l_ref)
        acc_ref[...] = jnp.zeros_like(acc_ref)

    q = q_ref[...].astype(compute_dtype)                    # (G, TQ, D)
    k = k_ref[...].astype(compute_dtype)                    # (G, TK, D)
    s = jnp.einsum("gqd,gkd->gqk", q, k,
                   preferred_element_type=jnp.float32)      # (G, TQ, TK), f32

    m_prev = m_ref[...]
    m_new = jnp.maximum(m_prev, jnp.max(s, axis=-1, keepdims=True))
    alpha = jnp.exp(m_prev - m_new)                         # rescale of old stats
    p = jnp.exp(s - m_new)
    l_ref[...] = alpha * l_ref[...] + jnp.sum(p, axis=-1, keepdims=True)
    acc_ref[...] = alpha * acc_ref[...] + jnp.einsum(
        "gqk,gkd->gqd", p.astype(compute_dtype), v_ref[...].astype(compute_dtype),
        preferred_element_type=jnp.float32)
    m_ref[...] = m_new

    @pl.when(ki == pl.num_programs(2) - 1)
    def _finalize():
        # Exact division for the softmax denominator (the approx reciprocal was
        # the source of the previous correctness failure).
        o_ref[...] = (acc_ref[...] / l_ref[...]).astype(o_ref.dtype)


def attention_pallas(q, k, v, compute_dtype=jnp.bfloat16):
    # q: (B*H, T, D), k/v: (B*H, S, D) — head-leading layout.
    bh, t, d = q.shape
    s = k.shape[1]
    g = _choose_head_group(bh)
    tq = _pick_tile(t, 256, 8)
    tk = _pick_tile(s, 512, 8)

    kern = functools.partial(_flash_attn_kernel, compute_dtype=compute_dtype)
    return pl.pallas_call(
        kern,
        out_shape=jax.ShapeDtypeStruct((bh, t, d), q.dtype),
        grid_spec=pltpu.PrefetchScalarGridSpec(
            num_scalar_prefetch=0,
            grid=(bh // g, t // tq, s // tk),
            in_specs=[
                pl.BlockSpec((g, tq, d), lambda b, qi, ki: (b, qi, 0)),
                pl.BlockSpec((g, tk, d), lambda b, qi, ki: (b, ki, 0)),
                pl.BlockSpec((g, tk, d), lambda b, qi, ki: (b, ki, 0)),
            ],
            out_specs=pl.BlockSpec((g, tq, d), lambda b, qi, ki: (b, qi, 0)),
            scratch_shapes=[
                pltpu.VMEM((g, tq, 1), jnp.float32),   # running max
                pltpu.VMEM((g, tq, 1), jnp.float32),   # running sum
                pltpu.VMEM((g, tq, d), jnp.float32),   # output accumulator
            ],
        ),
        compiler_params=pltpu.CompilerParams(
            dimension_semantics=("parallel", "parallel", "arbitrary"),
            vmem_limit_bytes=_VMEM_LIMIT),
    )(q, k, v)


# ----------------------------------------------------------------------------
# Module-equivalent forward
# ----------------------------------------------------------------------------
def global_multihead_attention(query, key, shape, value, params, num_heads,
                               compute_dtype=jnp.bfloat16):
    # `shape` is accepted for API parity with the PyTorch module but unused there.
    del shape
    tgt_len, bsz, embed_dim = query.shape
    src_len = key.shape[0]
    head_dim = embed_dim // num_heads
    scaling = float(head_dim) ** (-0.5)
    bh = bsz * num_heads

    W = params["in_proj_weight"]          # (9*E, E)
    B = params["in_proj_bias"]            # (9*E,)
    # Fold the softmax scaling into the Q projection (one-time XLA op).
    Wq, bq = W[0:embed_dim] * scaling, B[0:embed_dim] * scaling
    Wk, bk = W[embed_dim:2 * embed_dim], B[embed_dim:2 * embed_dim]
    Wv, bv = W[2 * embed_dim:3 * embed_dim], B[2 * embed_dim:3 * embed_dim]
    Wo, bo = params["out_proj_weight"], params["out_proj_bias"]

    q_in = query.reshape(tgt_len * bsz, embed_dim)
    k_in = key.reshape(src_len * bsz, embed_dim)
    v_in = value.reshape(src_len * bsz, embed_dim)

    # Fuse projections when inputs alias: one wide matmul reads the activations
    # from HBM once and improves MXU utilisation / lane density.
    if (query is key) and (key is value):
        w_all = jnp.concatenate([Wq, Wk, Wv], axis=0)
        b_all = jnp.concatenate([bq, bk, bv], axis=0)
        qkv = linear_pallas(q_in, w_all, b_all, compute_dtype)
        q2d = qkv[:, :embed_dim]
        k2d = qkv[:, embed_dim:2 * embed_dim]
        v2d = qkv[:, 2 * embed_dim:]
    elif key is value:
        q2d = linear_pallas(q_in, Wq, bq, compute_dtype)
        kv = linear_pallas(k_in, jnp.concatenate([Wk, Wv], axis=0),
                           jnp.concatenate([bk, bv], axis=0), compute_dtype)
        k2d, v2d = kv[:, :embed_dim], kv[:, embed_dim:]
    else:
        q2d = linear_pallas(q_in, Wq, bq, compute_dtype)
        k2d = linear_pallas(k_in, Wk, bk, compute_dtype)
        v2d = linear_pallas(v_in, Wv, bv, compute_dtype)

    # (L*B, E) -> (L, B*H, D) -> (B*H, L, D): head-leading layout so the attention
    # kernel sees dense (G, T, D)/(G, S, D) tiles (same transpose the module does).
    q = q2d.reshape(tgt_len, bh, head_dim).transpose(1, 0, 2)
    k = k2d.reshape(src_len, bh, head_dim).transpose(1, 0, 2)
    v = v2d.reshape(src_len, bh, head_dim).transpose(1, 0, 2)

    # dropout p = 0.0 in this module configuration -> identity (omitted).
    attn = attention_pallas(q, k, v, compute_dtype)        # (B*H, T, D)

    # (B*H, T, D) -> (T, B*H, D) -> (T*B, E), matching torch's transpose+view.
    attn = attn.transpose(1, 0, 2).reshape(tgt_len * bsz, embed_dim)
    out = linear_pallas(attn, Wo, bo, compute_dtype)
    return out.reshape(tgt_len, bsz, embed_dim)


# ----------------------------------------------------------------------------
# Pure-JAX reference (correctness check), high-precision matmuls.
# ----------------------------------------------------------------------------
def reference(query, key, value, params, num_heads):
    hp = jax.lax.Precision.HIGHEST
    tgt_len, bsz, E = query.shape
    src_len = key.shape[0]
    hd = E // num_heads
    W, B = params["in_proj_weight"], params["in_proj_bias"]
    q = jnp.dot(query, W[0:E].T, precision=hp) + B[0:E]
    k = jnp.dot(key, W[E:2 * E].T, precision=hp) + B[E:2 * E]
    v = jnp.dot(value, W[2 * E:3 * E].T, precision=hp) + B[2 * E:3 * E]
    q = q * (hd ** -0.5)
    q = q.reshape(tgt_len, bsz * num_heads, hd).transpose(1, 0, 2)
    k = k.reshape(src_len, bsz * num_heads, hd).transpose(1, 0, 2)
    v = v.reshape(src_len, bsz * num_heads, hd).transpose(1, 0, 2)
    s = jnp.einsum("btd,bsd->bts", q, k, precision=hp)
    p = jax.nn.softmax(s.astype(jnp.float32), axis=-1).astype(s.dtype)
    a = jnp.einsum("bts,bsd->btd", p, v, precision=hp)
    a = a.transpose(1, 0, 2).reshape(tgt_len, bsz, E)
    return jnp.dot(a, params["out_proj_weight"].T, precision=hp) + params["out_proj_bias"]


if __name__ == "__main__":
    root = jax.random.PRNGKey(0)
    embed_dim, num_heads = 32, 4
    tgt_len, src_len, bsz = 8, 8, 2
    NUM_WEIGHTS = 9

    k1, k2, k3, k4, k5 = jax.random.split(root, 5)

    def xavier(key_, shape):
        fan_out, fan_in = shape
        limit = (6.0 / (fan_in + fan_out)) ** 0.5
        return jax.random.uniform(key_, shape, jnp.float32, -limit, limit)

    params = {
        "in_proj_weight": xavier(k1, (NUM_WEIGHTS * embed_dim, embed_dim)),
        "in_proj_bias": jnp.zeros((NUM_WEIGHTS * embed_dim,), jnp.float32),
        "out_proj_weight": xavier(k2, (embed_dim, embed_dim)),
        "out_proj_bias": jnp.zeros((embed_dim,), jnp.float32),
    }

    query = jax.random.normal(k3, (tgt_len, bsz, embed_dim), jnp.float32)
    key_in = jax.random.normal(k4, (src_len, bsz, embed_dim), jnp.float32)
    value = jax.random.normal(k5, (src_len, bsz, embed_dim), jnp.float32)
    shape_arg = None  # unused by the forward

    ref = reference(query, key_in, value, params, num_heads)

    # 1) f32 compute path: strict elementwise check against the reference.
    out_f32 = global_multihead_attention(query, key_in, shape_arg, value, params,
                                         num_heads, compute_dtype=jnp.float32)
    out_f32 = jax.block_until_ready(out_f32)
    assert out_f32.shape == (tgt_len, bsz, embed_dim)
    assert jnp.allclose(out_f32, ref, atol=2e-3, rtol=2e-3), \
        float(jnp.max(jnp.abs(out_f32 - ref)))

    # 2) bf16 MXU-operand path (performance default): aggregate relative error.
    out_bf16 = global_multihead_attention(query, key_in, shape_arg, value, params,
                                          num_heads, compute_dtype=jnp.bfloat16)
    out_bf16 = jax.block_until_ready(out_bf16)
    rel_err = jnp.linalg.norm(out_bf16 - ref) / jnp.linalg.norm(ref)
    assert float(rel_err) < 2.5e-2, float(rel_err)

    # 3) Self-attention (query is key is value): exercises the fused QKV projection.
    self_ref = reference(query, query, query, params, num_heads)
    out_self = global_multihead_attention(query, query, shape_arg, query, params,
                                          num_heads, compute_dtype=jnp.float32)
    out_self = jax.block_until_ready(out_self)
    assert jnp.allclose(out_self, self_ref, atol=2e-3, rtol=2e-3), \
        float(jnp.max(jnp.abs(out_self - self_ref)))

    print("KERNEL_OK")
</pallas_src>

<mosaic_0001>
module attributes {stable_mosaic.version = 11 : i64} {
  func.func @_linear_kernel(%arg0: i32, %arg1: i32, %arg2: i32, %arg3: memref<16x32xf32, #tpu.memory_space<vmem>>, %arg4: memref<32x32xf32, #tpu.memory_space<vmem>>, %arg5: memref<1x32xf32, #tpu.memory_space<vmem>>, %arg6: memref<16x32xf32, #tpu.memory_space<vmem>>, %arg7: memref<16x32xf32, #tpu.memory_space<vmem>>) attributes {dimension_semantics = [#tpu.dimension_semantics<parallel>, #tpu.dimension_semantics<parallel>, #tpu.dimension_semantics<arbitrary>], iteration_bounds = array<i64: 1, 1, 1>, scalar_prefetch = 0 : i64, scratch_operands = 1 : i64, tpu.core_type = #tpu.core_type<tc>, window_params = [{transform_indices = @transform_0, window_bounds = array<i64: 16, 32>}, {transform_indices = @transform_1, window_bounds = array<i64: 32, 32>}, {transform_indices = @transform_2, window_bounds = array<i64: 1, 32>}, {transform_indices = @transform_3, window_bounds = array<i64: 16, 32>}]} {
    %c0_i32 = arith.constant 0 : i32
    %0 = arith.cmpi eq, %arg2, %c0_i32 : i32
    %1 = arith.extui %0 : i1 to i32
    %c0_i32_0 = arith.constant 0 : i32
    %2 = arith.cmpi ne, %1, %c0_i32_0 : i32
    scf.if %2 {
      %cst_10 = arith.constant 0.000000e+00 : f32
      %12 = vector.broadcast %cst_10 : f32 to vector<16x32xf32>
      %c0_11 = arith.constant 0 : index
      %c0_12 = arith.constant 0 : index
      %13 = vector.load %arg7[%c0_11, %c0_12] : memref<16x32xf32, #tpu.memory_space<vmem>>, vector<16x32xf32>
      tpu.vector_store %arg7[%c0_11, %c0_12], %12 {strides = array<i32>} : memref<16x32xf32, #tpu.memory_space<vmem>>, vector<16x32xf32>,
    } else {
    }
    %c0 = arith.constant 0 : index
    %c0_1 = arith.constant 0 : index
    %3 = vector.load %arg7[%c0, %c0_1] : memref<16x32xf32, #tpu.memory_space<vmem>>, vector<16x32xf32>
    %c0_2 = arith.constant 0 : index
    %c0_3 = arith.constant 0 : index
    %4 = vector.load %arg3[%c0_2, %c0_3] : memref<16x32xf32, #tpu.memory_space<vmem>>, vector<16x32xf32>
    %c0_4 = arith.constant 0 : index
    %c0_5 = arith.constant 0 : index
    %5 = vector.load %arg4[%c0_4, %c0_5] : memref<32x32xf32, #tpu.memory_space<vmem>>, vector<32x32xf32>
    %cst = arith.constant dense<0.000000e+00> : vector<16x32xf32>
    %6 = tpu.matmul %4, %5, %cst {dimension_numbers = #tpu.dot_dimension_numbers<[1], [1], [0], [0], [0, 0, 1, 0], [], []>} : vector<16x32xf32>, vector<32x32xf32>, vector<16x32xf32> -> vector<16x32xf32>
    %7 = arith.addf %3, %6 : vector<16x32xf32>
    %c0_6 = arith.constant 0 : index
    %c0_7 = arith.constant 0 : index
    %8 = vector.load %arg7[%c0_6, %c0_7] : memref<16x32xf32, #tpu.memory_space<vmem>>, vector<16x32xf32>
    tpu.vector_store %arg7[%c0_6, %c0_7], %7 {strides = array<i32>} : memref<16x32xf32, #tpu.memory_space<vmem>>, vector<16x32xf32>,
    %c0_i32_8 = arith.constant 0 : i32
    %9 = arith.cmpi eq, %arg2, %c0_i32_8 : i32
    %10 = arith.extui %9 : i1 to i32
    %c0_i32_9 = arith.constant 0 : i32
    %11 = arith.cmpi ne, %10, %c0_i32_9 : i32
    scf.if %11 {
      %c0_10 = arith.constant 0 : index
      %c0_11 = arith.constant 0 : index
      %12 = vector.load %arg7[%c0_10, %c0_11] : memref<16x32xf32, #tpu.memory_space<vmem>>, vector<16x32xf32>
      %c0_12 = arith.constant 0 : index
      %c0_13 = arith.constant 0 : index
      %13 = vector.load %arg5[%c0_12, %c0_13] : memref<1x32xf32, #tpu.memory_space<vmem>>, vector<1x32xf32>
      %14 = vector.broadcast %13 : vector<1x32xf32> to vector<16x32xf32>
      %15 = arith.addf %12, %14 : vector<16x32xf32>
      %c0_14 = arith.constant 0 : index
      %c0_15 = arith.constant 0 : index
      %16 = vector.load %arg6[%c0_14, %c0_15] : memref<16x32xf32, #tpu.memory_space<vmem>>, vector<16x32xf32>
      tpu.vector_store %arg6[%c0_14, %c0_15], %15 {strides = array<i32>} : memref<16x32xf32, #tpu.memory_space<vmem>>, vector<16x32xf32>,
    } else {
    }
    return
  }
  func.func @transform_0(%arg0: i32, %arg1: i32, %arg2: i32) -> (i32, i32) {
    %c0_i32 = arith.constant 0 : i32
    return %arg0, %arg2 : i32, i32
  }
  func.func @transform_1(%arg0: i32, %arg1: i32, %arg2: i32) -> (i32, i32) {
    %c0_i32 = arith.constant 0 : i32
    return %arg1, %arg2 : i32, i32
  }
  func.func @transform_2(%arg0: i32, %arg1: i32, %arg2: i32) -> (i32, i32) {
    %c0_i32 = arith.constant 0 : i32
    %c0_i32_0 = arith.constant 0 : i32
    return %c0_i32, %arg1 : i32, i32
  }
  func.func @transform_3(%arg0: i32, %arg1: i32, %arg2: i32) -> (i32, i32) {
    %c0_i32 = arith.constant 0 : i32
    return %arg0, %arg1 : i32, i32
  }
}

</mosaic_0001>

<bundles_post_ra>
// kernel: tpu_custom_call.1
= control target key start
LH: loop header
LB: loop body
LE: loop exit
PB: predicated region body
PF: predicated region fallthrough
CT: control target
= control target key end

     0   :  { %8 = vsyncpa [#allocation4], 0  ;;  %s439_s0 = inlined_call_operand.hbm [shape: f32[16,32], index: 0, kind: input, shape index: {}]   ;;  %s440_s1 = inlined_call_operand.hbm [shape: f32[32,32], index: 1, kind: input, shape index: {}]   ;;  %s441_s2 = inlined_call_operand.hbm [shape: f32[1,32], index: 2, kind: input, shape index: {}]   ;;  %s442_s3 = inlined_call_operand.hbm [shape: f32[16,32], index: 3, kind: output, shape index: {}]  }
   0x1   :  { %9 = vsyncpa [#allocation7], 0 }
   0x2   :  { %10 = vsyncpa [#allocation5], 0  ;;  %s338_s12 = smov [#allocation6]   ;;  %s339_s14 = smov [#allocation3]  }
   0x3   :  { %s28_s13 = sshll.u32 %s338_s12, 4  ;;  %s16_s15 = sshll.u32 %s339_s14, 4  ;;  %s29_s13 = int_to_ptr.vmem [resolvable:$true] %s28_s13  ;;  %s365_s15 = int_to_ptr.vmem [resolvable:$true] %s16_s15 }
   0x4   :  { %s244_s18 = scalar_lea.hbm %s440_s1, 512 }
   0x5   :  { %p245_p0 = scmp.ne.s32.totalorder %s440_s1, %s244_s18  ;;  %p248_p1 = scmp.lt.u32.totalorder %s244_s18, %s440_s1 }
   0x7   :  { %p250_p2 = pnand %p248_p1, %p245_p0 }
   0x9   :  { %253 = shalt.err (!%p250_p2)
}
   0xa   :  { %s254_s23 = scalar_lea.vmem %s29_s13, 512  ;;  %p259_p4 = scmp.lt.s32.totalorder %s29_s13, %s29_s13 }
   0xb   :  { %p255_p3 = scmp.ne.s32.totalorder %s29_s13, %s254_s23  ;;  %p260_p5 = scmp.lt.s32.totalorder %s254_s23, %s254_s23 }
   0xd   :  { %p261_p6 = por %p260_p5, %p259_p4 }
   0xf   :  { %p262_p7 = pnand %p261_p6, %p255_p3 }
  0x11   :  { %265 = shalt.err (!%p262_p7)
}
  0x12   :  { %s340_s24 = smov 128   ;;  %s341_s25 = smov 8  }
  0x13   :  { %34 = dma.hbm_to_vmem [thread:$0]  %s440_s1, 512, %s29_s13, [#allocation7], %s340_s24, %s340_s24, %s341_s25  }
  0x14   :  { %s266_s30 = scalar_lea.hbm %s439_s0, 256 }
  0x15   :  { %p267_p8 = scmp.ne.s32.totalorder %s439_s0, %s266_s30  ;;  %p270_p9 = scmp.lt.u32.totalorder %s266_s30, %s439_s0 }
  0x17   :  { %p272_p10 = pnand %p270_p9, %p267_p8 }
  0x19   :  { %275 = shalt.err (!%p272_p10)
}
  0x1a   :  { %s276_s8 = scalar_lea.vmem %s365_s15, 256  ;;  %p281_p12 = scmp.lt.s32.totalorder %s365_s15, %s365_s15 }
  0x1b   :  { %p277_p11 = scmp.ne.s32.totalorder %s365_s15, %s276_s8  ;;  %p282_p13 = scmp.lt.s32.totalorder %s276_s8, %s276_s8 }
  0x1d   :  { %p283_p0 = por %p282_p13, %p281_p12 }
  0x1f   :  { %p284_p1 = pnand %p283_p0, %p277_p11 }
  0x21   :  { %287 = shalt.err (!%p284_p1)
}
  0x22   :  { %22 = dma.hbm_to_vmem [thread:$0]  %s439_s0, 256, %s365_s15, [#allocation4], %s340_s24, %s340_s24, %s341_s25  }
  0x23   :  { %s342_s10 = smov [#allocation8]   ;;  %s288_s14 = scalar_lea.hbm %s441_s2, 16 }
  0x24   :  { %s41_s11 = sshll.u32 %s342_s10, 4  ;;  %p289_p2 = scmp.ne.s32.totalorder %s441_s2, %s288_s14  ;;  %s42_s11 = int_to_ptr.vmem [resolvable:$true] %s41_s11 }
  0x25   :  { %p292_p3 = scmp.lt.u32.totalorder %s288_s14, %s441_s2 }
  0x27   :  { %p294_p4 = pnand %p292_p3, %p289_p2 }
  0x29   :  { %297 = shalt.err (!%p294_p4)
}
  0x2a   :  { %s298_s20 = scalar_lea.vmem %s42_s11, 16  ;;  %s302_s0 = scalar_lea.vmem %s42_s11, 32 }
  0x2b   :  { %p299_p5 = scmp.ne.s32.totalorder %s42_s11, %s298_s20  ;;  %p303_p6 = scmp.lt.s32.totalorder %s42_s11, %s42_s11 }
  0x2c   :  { %p304_p7 = scmp.lt.s32.totalorder %s302_s0, %s298_s20 }
  0x2e   :  { %p305_p8 = por %p304_p7, %p303_p6 }
  0x30   :  { %p306_p9 = pnand %p305_p8, %p299_p5 }
  0x32   :  { %309 = shalt.err (!%p306_p9)
}
  0x33   :  { %44 = dma.hbm_to_vmem [thread:$0]  %s441_s2, 16, %s42_s11, [#allocation7]  }
  0x34   :  { %332 = dma.done.wait [#allocation4], 256  }
  0x35   :  { %333 = vsyncadd [#allocation4], 4294967040 }
  0x36   :  { %334 = dma.done.wait [#allocation7], 528  }
  0x37   :  { %335 = vsyncadd [#allocation7], 4294966768  ;;  %vm58_vm0 = vcmask 261120   ;;  %v343_v0 = vmov 0.0   ;;  %v65_v1 = vld [vmem:[#allocation6] sm:$0xff]  ;;  %v66_v2 = vld [vmem:[#allocation6 + $0x8] sm:$0xff] }
  0x38   :  { %60 = vst.msk [vmem:[#allocation2 + $0x8] sm:$0xff] %vm58_vm0, %v343_v0  ;;  %59 = vst.msk [vmem:[#allocation2] sm:$0xff] %vm58_vm0, %v343_v0  ;;  %v67_v3 = vld [vmem:[#allocation6 + $0x10] sm:$0xff]  ;;  %v225_v4 = vpack.c.bf16 %v66_v2, %v65_v1  ;;  %v68_v5 = vld [vmem:[#allocation6 + $0x18] sm:$0xff]  ;;  %s344_s2 = smov [#allocation9]  }
  0x39   :  { %vm226_vm1 = vmpackc.low %vm58_vm0, %vm58_vm0  ;;  %v63_v6 = vld [vmem:[#allocation3] sm:$0xff]  ;;  %v231_v7 = vpack.c.bf16 %v68_v5, %v67_v3  ;;  %v64_v8 = vld [vmem:[#allocation3 + $0x8] sm:$0xff]  ;;  %s188_s22 = sshll.u32 %s344_s2, 4  ;;  %s189_s22 = int_to_ptr.vmem [resolvable:$true] %s188_s22 }
  0x3a   :  { %222 = vmatprep.mubr.msk.f32.mxu0 %vm58_vm0, %v63_v6  ;;  %227 = vmatprep.subr.msk.bf16.mxu0 %vm226_vm1, %v225_v4  ;;  %v207_v15 = vld [vmem:[#allocation8] ss:$0 sm:$0xff]  ;;  %s310_s23 = scalar_lea.vmem %s189_s22, 256  ;;  %p315_p11 = scmp.lt.s32.totalorder %s189_s22, %s189_s22 }
  0x3b   :  { %230 = vmatpush3.bf16.xpose.msk.msra.mxu0 %vm226_vm1, %v225_v4  ;;  %p311_p10 = scmp.ne.s32.totalorder %s189_s22, %s310_s23  ;;  %p316_p12 = scmp.lt.s32.totalorder %s310_s23, %s310_s23 }
  0x3c   :  { %233 = vmatprep.subr.msk.bf16.mxu0 %vm226_vm1, %v231_v7 }
  0x3d   :  { %p317_p13 = por %p316_p12, %p315_p11 }
  0x3f   :  { %v62_v9 = vld [vmem:[#allocation2 + $0x8] sm:$0xff]  ;;  %v61_v10 = vld [vmem:[#allocation2] sm:$0xff]  ;;  %p318_p0 = pnand %p317_p13, %p311_p10 }
  0x43   :  { %236 = vmatpush3.bf16.xpose.msk.msra.mxu0 %vm226_vm1, %v231_v7 }
  0x4a   :  { %223 = vmatmul.mubr.msk.f32.vlgmr.msra.gmra.mrb[0].mxu0 %vm58_vm0, %v64_v8 }
 0x11d   :  { %v224_v11 = vpop.f32.mrb[0].mxu0 }
 0x11e   :  { %v164_v12 = vadd.f32 %v224_v11, %v62_v9  ;;  %v154_v13 = vpop.f32.mrb[1].mxu0 }
 0x11f   :  { %v163_v14 = vadd.f32 %v154_v13, %v61_v10 }
 0x120   :  { %166 = vst.msk [vmem:[#allocation2 + $0x8] sm:$0xff] %vm58_vm0, %v164_v12 }
 0x121   :  { %165 = vst.msk [vmem:[#allocation2] sm:$0xff] %vm58_vm0, %v163_v14 }
 0x127   :  { %v171_v16 = vld [vmem:[#allocation2 + $0x8] sm:$0xff] }
 0x128   :  { %v170_v17 = vld [vmem:[#allocation2] sm:$0xff]  ;;  %v180_v18 = vadd.f32 %v207_v15, %v171_v16 }
 0x129   :  { %v179_v19 = vadd.f32 %v207_v15, %v170_v17 }
 0x12a   :  { %182 = vst.msk [vmem:[#allocation9 + $0x8] sm:$0xff] %vm58_vm0, %v180_v18 }
 0x12b   :  { %181 = vst.msk [vmem:[#allocation9] sm:$0xff] %vm58_vm0, %v179_v19 }
 0x12c   :  { %321 = shalt.err (!%p318_p0)
}
 0x12d   :  { %s322_s28 = scalar_lea.hbm %s442_s3, 256 }
 0x12e   :  { %p323_p1 = scmp.ne.s32.totalorder %s442_s3, %s322_s28  ;;  %p326_p2 = scmp.lt.u32.totalorder %s322_s28, %s442_s3 }
 0x130   :  { %p328_p3 = pnand %p326_p2, %p323_p1 }
 0x132   :  { %331 = shalt.err (!%p328_p3)
}
 0x133   :  { %194 = dma.vmem_to_hbm [thread:$0]  %s189_s22, 256, %s442_s3, [#allocation5], %s340_s24, %s340_s24, %s341_s25  }
 0x134   :  { %336 = dma.done.wait [#allocation5], 256  }
 0x135   :  { %337 = vsyncadd [#allocation5], 4294967040 }
 0x136   :  { %198 = vsyncpa [#allocation4], 1 }
 0x137   :  { %199 = vsyncpa [#allocation7], 1 }
 0x138   :  { %200 = vsyncpa [#allocation5], 1 }

</bundles_post_ra>
